<compile_context>
chip_gen: v6e
topology: v6e:2x2x1
jax: 0.10.0
libtpu: 0.0.40
codegen_flags: <defaults>
</compile_context>

<pallas_src>
import jax
import jax.numpy as jnp
from jax import lax
from jax.experimental import pallas as pl
from jax.experimental.pallas import tpu as pltpu

_COS_EPS = 1e-8                  # F.cosine_similarity default eps
_LANES = 128
_TARGET_BLOCK_BYTES = 4 << 20    # ~4 MiB / input / block (2 in x 2 bufs = 16 MiB)
_MIN_GRID_BLOCKS = 8             # >= 4 blocks per TensorCore on v7x megacore
_MIN_KERNEL_ROWS = 32768         # below this, pallas_call dispatch dominates
_VMEM_LIMIT = 32 * 1024 * 1024   # <= physical VMEM on v5e / v6e / v7x


def _round_up(x, m):
    return ((x + m - 1) // m) * m


# ---------------------------------------------------------------------------
# Pure-JAX reference / small-N fast path / <128-row tail epilogue.
# ---------------------------------------------------------------------------
def _partial_sums_ref(pred, target):
    p = pred.astype(jnp.float32)
    t = target.astype(jnp.float32)
    mask = jnp.any(t != 0.0, axis=-1)
    dot = jnp.sum(p * t, axis=-1)
    denom = jnp.maximum(
        jnp.sqrt(jnp.sum(p * p, axis=-1)) * jnp.sqrt(jnp.sum(t * t, axis=-1)),
        _COS_EPS)
    loss = jnp.where(mask, 1.0 - dot / denom, 0.0)
    return jnp.sum(loss), jnp.sum(mask.astype(jnp.float32))


def _reference(pred, target, reduction='mean', eps=1e-6):
    loss_sum, cnt = _partial_sums_ref(pred, target)
    if reduction == 'mean':
        return loss_sum / (cnt + eps)
    return loss_sum


# ---------------------------------------------------------------------------
# Pallas kernel.
# ---------------------------------------------------------------------------
def _make_kernel(r_total, d, chunk, nchunks):
    """Kernel over one (br, d*128) block of 128-row groups (br = chunk*nchunks)."""

    def kernel(sel_ref, p_ref, t_ref, out_ref):
        base = pl.program_id(0) * (chunk * nchunks)   # first group-row of block
        sel = sel_ref[...]                            # (d*128, 128) f32, 0/1

        def body(c, carry):
            loss_acc, cnt_acc = carry
            start = pl.multiple_of(c * chunk, chunk)
            p = p_ref[pl.ds(start, chunk), :].astype(jnp.float32)  # (chunk, d*128)
            t = t_ref[pl.ds(start, chunk), :].astype(jnp.float32)

            # Per-row sums over the d interleaved components via a 0/1
            # selection matmul: out[r, k] = sum_c in[r, d*k + c].  Exact in f32
            # (each output is a d-term f32 sum) and runs on the MXU, leaving
            # the VPU free for the lane-dense elementwise epilogue.
            dot = jnp.dot(p * t, sel, preferred_element_type=jnp.float32)
            psq = jnp.dot(p * p, sel, preferred_element_type=jnp.float32)
            tsq = jnp.dot(t * t, sel, preferred_element_type=jnp.float32)

            # cos = <p,t> / max(||p|| * ||t||, eps)  (torch formula).  The
            # sqrt-then-multiply order cannot overflow f32 like psq*tsq can.
            denom = jnp.maximum(jnp.sqrt(psq) * jnp.sqrt(tsq), _COS_EPS)
            cos = dot / denom

            # Row validity: group-rows past r_total belong to the ragged last
            # block and hold stale VMEM -> gate with `where` (NaN-safe), never
            # with a multiply.  tsq > 0 is the torch.any(target != 0) mask.
            rows = (base + start +
                    lax.broadcasted_iota(jnp.int32, (chunk, _LANES), 0))
            valid = jnp.logical_and(rows < r_total, tsq > 0.0)

            loss = jnp.where(valid, 1.0 - cos, 0.0)
            loss_acc = loss_acc + jnp.sum(loss)
            cnt_acc = cnt_acc + jnp.sum(valid.astype(jnp.float32))
            return loss_acc, cnt_acc

        loss_sum, cnt_sum = lax.fori_loop(
            0, nchunks, body, (jnp.float32(0.0), jnp.float32(0.0)))
        out_ref[0, 0] = loss_sum
        out_ref[0, 1] = cnt_sum

    return kernel


def _pick_block_groups(r, d, itemsize, block_groups=None):
    """Block size along the 128-row-group axis + the in-kernel chunk size."""
    sub = {1: 32, 2: 16, 4: 8}.get(itemsize, 8)       # packed sublane tile
    if block_groups is not None:                      # explicit override
        br = max(sub, _round_up(block_groups, sub))
        if br > 128:
            br = _round_up(br, 128)
        return br, min(br, 128)
    if r <= 128:
        br = _round_up(r, sub)
        return br, br
    chunk = 128
    bytes_per_group = d * _LANES * itemsize
    # ~_TARGET_BLOCK_BYTES per input per block (amortizes the ~0.35us/step
    # grid overhead at v7x's 3.2 TB/s), ...
    br_cap = max(chunk, (_TARGET_BLOCK_BYTES // bytes_per_group) // chunk * chunk)
    # ... but keep >= _MIN_GRID_BLOCKS steps so both v7x cores get work and the
    # DMA pipeline has depth.
    br_spread = max(chunk, (r // _MIN_GRID_BLOCKS) // chunk * chunk)
    return min(br_cap, br_spread), chunk


def _kernel_partial_sums(pred_main, target_main, r, d, block_groups):
    """(loss_sum, mask_count) over the first r*128 rows via the Pallas kernel."""
    itemsize = jnp.dtype(pred_main.dtype).itemsize
    br, chunk = _pick_block_groups(r, d, itemsize, block_groups)
    nchunks = br // chunk
    grid = pl.cdiv(r, br)
    lanes = d * _LANES

    # 0/1 de-interleave matrix: sel[j, k] = 1  iff  j // d == k.
    j = jnp.arange(lanes, dtype=jnp.int32)
    k = jnp.arange(_LANES, dtype=jnp.int32)
    sel = (j[:, None] // d == k[None, :]).astype(jnp.float32)

    cost = pl.CostEstimate(
        flops=int(r * (6 * d * _LANES * _LANES + 16 * d * _LANES)),
        transcendentals=int(3 * r * _LANES),
        bytes_accessed=int(2 * r * lanes * itemsize + lanes * _LANES * 4 + grid * 8),
    )

    parts = pl.pallas_call(
        _make_kernel(r, d, chunk, nchunks),
        out_shape=jax.ShapeDtypeStruct((grid, 2), jnp.float32),
        grid=(grid,),
        in_specs=[
            pl.BlockSpec((lanes, _LANES), lambda i: (0, 0)),   # sel: fetched once
            pl.BlockSpec((br, lanes), lambda i: (i, 0)),       # pred row-groups
            pl.BlockSpec((br, lanes), lambda i: (i, 0)),       # target row-groups
        ],
        out_specs=pl.BlockSpec((1, 2), lambda i: (i, 0), memory_space=pltpu.SMEM),
        compiler_params=pltpu.CompilerParams(
            dimension_semantics=("parallel",),                 # v7x 2-TC shardable
            vmem_limit_bytes=_VMEM_LIMIT,
        ),
        cost_estimate=cost,
    )(sel, pred_main, target_main)

    return jnp.sum(parts[:, 0]), jnp.sum(parts[:, 1])


# ---------------------------------------------------------------------------
# Public wrapper (mirrors CosineLoss.forward).
# ---------------------------------------------------------------------------
def cosine_loss(pred, target, reduction='mean', eps=1e-6, *,
                block_groups=None, use_kernel=None):
    """Pallas implementation of CosineLoss.forward; returns a scalar float32.

    Keep inputs in their HBM dtype (e.g. bf16); the kernel casts to f32
    internally, so pre-casting in the caller only wastes HBM bandwidth.
    """
    assert pred.shape == target.shape and pred.ndim == 2
    n, d = pred.shape

    if use_kernel is None:
        use_kernel = n >= _MIN_KERNEL_ROWS
    r = n // _LANES

    if not use_kernel or r == 0:
        # Small-N fast path: pallas_call dispatch would dominate ~20 FLOPs/row.
        loss_sum, cnt = _partial_sums_ref(pred, target)
    else:
        n_main = r * _LANES
        if n_main == n:
            pred_main, target_main = pred, target
            loss_sum, cnt = jnp.float32(0.0), jnp.float32(0.0)
        else:
            # < 128 leftover rows: tiny fused pure-JAX epilogue (no full pad).
            pred_main, target_main = pred[:n_main], target[:n_main]
            loss_sum, cnt = _partial_sums_ref(pred[n_main:], target[n_main:])
        # Free row-major reshape: rows stay in memory order, the d components
        # are interleaved along the d*128 lane axis (no transpose pass).
        pred_main = pred_main.reshape(r, d * _LANES)
        target_main = target_main.reshape(r, d * _LANES)
        k_loss, k_cnt = _kernel_partial_sums(pred_main, target_main, r, d,
                                             block_groups)
        loss_sum = loss_sum + k_loss
        cnt = cnt + k_cnt

    if reduction == 'mean':
        return loss_sum / (cnt + eps)
    return loss_sum


# ---------------------------------------------------------------------------
# Self-test.
# ---------------------------------------------------------------------------
if __name__ == "__main__":
    key = jax.random.PRNGKey(0)
    keys = jax.random.split(key, 10)
    D = 3

    def _check(got, want, tag, rtol=1e-4, atol=1e-5):
        got = jax.block_until_ready(got)
        want = jax.block_until_ready(want)
        assert jnp.allclose(got, want, rtol=rtol, atol=atol), (tag, got, want)

    # 1) Docstring-scale case (8 vectors): automatic small-N fast path.
    p0 = jax.random.normal(keys[0], (8, D), dtype=jnp.float32)
    t0 = jax.random.normal(keys[1], (8, D), dtype=jnp.float32)
    t0 = t0.at[0].set(0.0).at[3].set(0.0)
    _check(cosine_loss(p0, t0, reduction='mean'), _reference(p0, t0, 'mean'), "tiny/mean")
    _check(cosine_loss(p0, t0, reduction='sum'), _reference(p0, t0, 'sum'), "tiny/sum")

    # 2) Kernel path, N not a multiple of 128: ragged last block (r=7, br=8)
    #    masked in-kernel + 104-row pure-JAX tail; zero-target rows exercised.
    n1 = 1000
    p1 = jax.random.normal(keys[2], (n1, D), dtype=jnp.float32)
    t1 = jax.random.normal(keys[3], (n1, D), dtype=jnp.float32)
    t1 = t1.at[jnp.arange(0, n1, 17)].set(0.0)
    for red in ('mean', 'sum'):
        _check(cosine_loss(p1, t1, reduction=red, use_kernel=True),
               _reference(p1, t1, red), f"ragged/{red}")

    # 3) Kernel path, exact multiple of 128, multi-block "parallel" grid
    #    (block_groups=8 -> grid of 4 per-block partials summed in the wrapper).
    n2 = 4096
    p2 = jax.random.normal(keys[4], (n2, D), dtype=jnp.float32)
    t2 = jax.random.normal(keys[5], (n2, D), dtype=jnp.float32)
    t2 = t2.at[jnp.arange(0, n2, 33)].set(0.0)
    _check(cosine_loss(p2, t2, reduction='mean', use_kernel=True, block_groups=8),
           _reference(p2, t2, 'mean'), "multiblock/mean")

    # 4) bf16 inputs stay bf16 on the wire (kernel casts to f32 internally).
    n3 = 2048
    p3 = jax.random.normal(keys[6], (n3, D), dtype=jnp.float32).astype(jnp.bfloat16)
    t3 = jax.random.normal(keys[7], (n3, D), dtype=jnp.float32).astype(jnp.bfloat16)
    t3 = t3.at[jnp.arange(0, n3, 11)].set(jnp.bfloat16(0.0))
    _check(cosine_loss(p3, t3, reduction='mean', use_kernel=True),
           _reference(p3, t3, 'mean'), "bf16/mean")

    # 5) Multi-chunk inner fori_loop (block_groups=256 -> 2 x 128-group chunks).
    n4 = 32768
    p4 = jax.random.normal(keys[8], (n4, D), dtype=jnp.float32)
    t4 = jax.random.normal(keys[9], (n4, D), dtype=jnp.float32)
    _check(cosine_loss(p4, t4, reduction='mean', block_groups=256),
           _reference(p4, t4, 'mean'), "chunked/mean")

    print("KERNEL_OK")
</pallas_src>

<mosaic_0001>
module attributes {stable_mosaic.version = 11 : i64} {
  func.func @kernel(%arg0: i32, %arg1: memref<384x128xf32, #tpu.memory_space<vmem>>, %arg2: memref<8x384xf32, #tpu.memory_space<vmem>>, %arg3: memref<8x384xf32, #tpu.memory_space<vmem>>, %arg4: memref<1x2xf32, #tpu.memory_space<smem>>) attributes {dimension_semantics = [#tpu.dimension_semantics<parallel>], iteration_bounds = array<i64: 1>, scalar_prefetch = 0 : i64, scratch_operands = 0 : i64, tpu.core_type = #tpu.core_type<tc>, window_params = [{pipeline_mode = #tpu.pipeline_mode<synchronous>, transform_indices = @transform_0, window_bounds = array<i64: 384, 128>}, {transform_indices = @transform_1, window_bounds = array<i64: 8, 384>}, {transform_indices = @transform_2, window_bounds = array<i64: 8, 384>}, {transform_indices = @transform_3, window_bounds = array<i64: 1, 2>}]} {
    %c8_i32 = arith.constant 8 : i32
    %0 = arith.muli %arg0, %c8_i32 : i32
    %c0 = arith.constant 0 : index
    %c0_0 = arith.constant 0 : index
    %1 = vector.load %arg1[%c0, %c0_0] : memref<384x128xf32, #tpu.memory_space<vmem>>, vector<384x128xf32>
    %cst = arith.constant 0.000000e+00 : f32
    %cst_1 = arith.constant 0.000000e+00 : f32
    %c0_i32 = arith.constant 0 : i32
    %c8_i32_2 = arith.constant 8 : i32
    %2 = arith.muli %c0_i32, %c8_i32_2 : i32
    %3 = tpu.assume_multiple %2, 8 : i32
    %4 = arith.index_cast %3 : i32 to index
    %c0_3 = arith.constant 0 : index
    %5 = vector.load %arg2[%4, %c0_3] : memref<8x384xf32, #tpu.memory_space<vmem>>, vector<8x384xf32>
    %6 = arith.index_cast %3 : i32 to index
    %c0_4 = arith.constant 0 : index
    %7 = vector.load %arg3[%6, %c0_4] : memref<8x384xf32, #tpu.memory_space<vmem>>, vector<8x384xf32>
    %8 = arith.mulf %5, %7 : vector<8x384xf32>
    %cst_5 = arith.constant dense<0.000000e+00> : vector<8x128xf32>
    %9 = tpu.matmul %8, %1, %cst_5 {dimension_numbers = #tpu.dot_dimension_numbers<[1], [0], [0], [1], [0, 0, 1, 1], [], []>} : vector<8x384xf32>, vector<384x128xf32>, vector<8x128xf32> -> vector<8x128xf32>
    %10 = arith.mulf %5, %5 : vector<8x384xf32>
    %cst_6 = arith.constant dense<0.000000e+00> : vector<8x128xf32>
    %11 = tpu.matmul %10, %1, %cst_6 {dimension_numbers = #tpu.dot_dimension_numbers<[1], [0], [0], [1], [0, 0, 1, 1], [], []>} : vector<8x384xf32>, vector<384x128xf32>, vector<8x128xf32> -> vector<8x128xf32>
    %12 = arith.mulf %7, %7 : vector<8x384xf32>
    %cst_7 = arith.constant dense<0.000000e+00> : vector<8x128xf32>
    %13 = tpu.matmul %12, %1, %cst_7 {dimension_numbers = #tpu.dot_dimension_numbers<[1], [0], [0], [1], [0, 0, 1, 1], [], []>} : vector<8x384xf32>, vector<384x128xf32>, vector<8x128xf32> -> vector<8x128xf32>
    %14 = math.sqrt %11 : vector<8x128xf32>
    %15 = math.sqrt %13 : vector<8x128xf32>
    %16 = arith.mulf %14, %15 : vector<8x128xf32>
    %cst_8 = arith.constant 9.99999993E-9 : f32
    %17 = vector.broadcast %cst_8 : f32 to vector<8x128xf32>
    %18 = arith.maximumf %16, %17 : vector<8x128xf32>
    %19 = arith.divf %9, %18 : vector<8x128xf32>
    %20 = arith.addi %0, %3 : i32
    %21 = tpu.iota {dimensions = array<i32: 0>} : vector<8x128xi32>
    %22 = vector.broadcast %20 : i32 to vector<8x128xi32>
    %23 = arith.addi %22, %21 : vector<8x128xi32>
    %c7_i32 = arith.constant 7 : i32
    %24 = vector.broadcast %c7_i32 : i32 to vector<8x128xi32>
    %25 = arith.cmpi slt, %23, %24 : vector<8x128xi32>
    %cst_9 = arith.constant 0.000000e+00 : f32
    %26 = vector.broadcast %cst_9 : f32 to vector<8x128xf32>
    %27 = arith.cmpf ogt, %13, %26 : vector<8x128xf32>
    %28 = arith.andi %25, %27 : vector<8x128xi1>
    %cst_10 = arith.constant 1.000000e+00 : f32
    %29 = vector.broadcast %cst_10 : f32 to vector<8x128xf32>
    %30 = arith.subf %29, %19 : vector<8x128xf32>
    %cst_11 = arith.constant 0.000000e+00 : f32
    %31 = vector.broadcast %cst_11 : f32 to vector<8x128xf32>
    %32 = arith.select %28, %30, %31 : vector<8x128xi1>, vector<8x128xf32>
    %33 = vector.shape_cast %32 : vector<8x128xf32> to vector<1x8x128xf32>
    %cst_12 = arith.constant dense<0.000000e+00> : vector<1xf32>
    %34 = vector.multi_reduction <add>, %33, %cst_12 [1, 2] : vector<1x8x128xf32> to vector<1xf32>
    %35 = vector.shape_cast %34 : vector<1xf32> to vector<1x1x1xf32>
    %36 = vector.extract %35[0, 0, 0] : f32 from vector<1x1x1xf32>
    %37 = arith.addf %cst, %36 : f32
    %38 = arith.extui %28 : vector<8x128xi1> to vector<8x128xi32>
    %39 = arith.sitofp %38 : vector<8x128xi32> to vector<8x128xf32>
    %40 = vector.shape_cast %39 : vector<8x128xf32> to vector<1x8x128xf32>
    %cst_13 = arith.constant dense<0.000000e+00> : vector<1xf32>
    %41 = vector.multi_reduction <add>, %40, %cst_13 [1, 2] : vector<1x8x128xf32> to vector<1xf32>
    %42 = vector.shape_cast %41 : vector<1xf32> to vector<1x1x1xf32>
    %43 = vector.extract %42[0, 0, 0] : f32 from vector<1x1x1xf32>
    %44 = arith.addf %cst_1, %43 : f32
    %c1_i32 = arith.constant 1 : i32
    %c0_14 = arith.constant 0 : index
    %c0_15 = arith.constant 0 : index
    %45 = memref.load %arg4[%c0_14, %c0_15] : memref<1x2xf32, #tpu.memory_space<smem>>
    memref.store %37, %arg4[%c0_14, %c0_15] : memref<1x2xf32, #tpu.memory_space<smem>>
    %c0_16 = arith.constant 0 : index
    %c1 = arith.constant 1 : index
    %46 = memref.load %arg4[%c0_16, %c1] : memref<1x2xf32, #tpu.memory_space<smem>>
    memref.store %44, %arg4[%c0_16, %c1] : memref<1x2xf32, #tpu.memory_space<smem>>
    return
  }
  func.func @transform_0(%arg0: i32) -> (i32, i32) {
    %c0_i32 = arith.constant 0 : i32
    %c0_i32_0 = arith.constant 0 : i32
    %c0_i32_1 = arith.constant 0 : i32
    return %c0_i32, %c0_i32_0 : i32, i32
  }
  func.func @transform_1(%arg0: i32) -> (i32, i32) {
    %c0_i32 = arith.constant 0 : i32
    %c0_i32_0 = arith.constant 0 : i32
    return %arg0, %c0_i32 : i32, i32
  }
  func.func @transform_2(%arg0: i32) -> (i32, i32) {
    %c0_i32 = arith.constant 0 : i32
    %c0_i32_0 = arith.constant 0 : i32
    return %arg0, %c0_i32 : i32, i32
  }
  func.func @transform_3(%arg0: i32) -> (i32, i32) {
    %c0_i32 = arith.constant 0 : i32
    %c0_i32_0 = arith.constant 0 : i32
    return %arg0, %c0_i32 : i32, i32
  }
}

</mosaic_0001>

<bundles_post_ra>
// kernel: tpu_custom_call.1
= control target key start
LH: loop header
LB: loop body
LE: loop exit
PB: predicated region body
PF: predicated region fallthrough
CT: control target
= control target key end

     0   :  { %8 = vsyncpa [#allocation3], 0  ;;  %s1329_s0 = inlined_call_operand.hbm [shape: f32[384,128], index: 0, kind: input, shape index: {}]   ;;  %s1330_s1 = inlined_call_operand.hbm [shape: f32[7,384], index: 1, kind: input, shape index: {}]   ;;  %s1331_s2 = inlined_call_operand.hbm [shape: f32[7,384], index: 2, kind: input, shape index: {}]   ;;  %s1332_s3 = inlined_call_operand.hbm [shape: f32[1,2], index: 3, kind: output, shape index: {}]  }
   0x1   :  { %9 = vsyncpa [#allocation6], 0 }
   0x2   :  { %10 = vsyncpa [#allocation4], 0  ;;  %s964_s12 = smov [#allocation5]   ;;  %s965_s14 = smov [#allocation2]  }
   0x3   :  { %s29_s13 = sshll.u32 %s964_s12, 4  ;;  %s16_s15 = sshll.u32 %s965_s14, 4  ;;  %s30_s13 = int_to_ptr.vmem [resolvable:$true] %s29_s13  ;;  %s17_s15 = int_to_ptr.vmem [resolvable:$true] %s16_s15 }
   0x4   :  { %s898_s16 = scalar_lea.vmem %s30_s13, 384  ;;  %p903_p1 = scmp.lt.s32.totalorder %s30_s13, %s30_s13 }
   0x5   :  { %p899_p0 = scmp.ne.s32.totalorder %s30_s13, %s898_s16  ;;  %p904_p2 = scmp.lt.s32.totalorder %s898_s16, %s898_s16 }
   0x7   :  { %p905_p3 = por %p904_p2, %p903_p1 }
   0x9   :  { %p906_p4 = pnand %p905_p3, %p899_p0 }
   0xb   :  { %909 = shalt.err (!%p906_p4)
}
   0xc   :  { %32 = dma.hbm_to_vmem [thread:$0]  %s1330_s1, 384, %s30_s13, [#allocation6]  }
   0xd   :  { %s918_s19 = scalar_lea.vmem %s17_s15, 6144  ;;  %p923_p6 = scmp.lt.s32.totalorder %s17_s15, %s17_s15 }
   0xe   :  { %p919_p5 = scmp.ne.s32.totalorder %s17_s15, %s918_s19  ;;  %p924_p7 = scmp.lt.s32.totalorder %s918_s19, %s918_s19 }
  0x10   :  { %p925_p8 = por %p924_p7, %p923_p6 }
  0x12   :  { %p926_p9 = pnand %p925_p8, %p919_p5 }
  0x14   :  { %929 = shalt.err (!%p926_p9)
}
  0x15   :  { %s966_s20 = smov 128   ;;  %s967_s21 = smov 8  }
  0x16   :  { %22 = dma.hbm_to_vmem [thread:$0]  %s1329_s0, 6144, %s17_s15, [#allocation3], %s966_s20, %s966_s20, %s967_s21  }
  0x17   :  { %s968_s24 = smov [#allocation7]  }
  0x18   :  { %s39_s25 = sshll.u32 %s968_s24, 4  ;;  %s40_s25 = int_to_ptr.vmem [resolvable:$true] %s39_s25 }
  0x19   :  { %s938_s26 = scalar_lea.vmem %s40_s25, 384  ;;  %p943_p11 = scmp.lt.s32.totalorder %s40_s25, %s40_s25 }
  0x1a   :  { %p939_p10 = scmp.ne.s32.totalorder %s40_s25, %s938_s26  ;;  %p944_p12 = scmp.lt.s32.totalorder %s938_s26, %s938_s26 }
  0x1c   :  { %p945_p13 = por %p944_p12, %p943_p11 }
  0x1e   :  { %p946_p0 = pnand %p945_p13, %p939_p10 }
  0x20   :  { %949 = shalt.err (!%p946_p0)
}
  0x21   :  { %42 = dma.hbm_to_vmem [thread:$0]  %s1331_s2, 384, %s40_s25, [#allocation6]  }
  0x22   :  { %958 = dma.done.wait [#allocation3], 6144  }
  0x23   :  { %959 = vsyncadd [#allocation3], 4294961152 }
  0x24   :  { %960 = dma.done.wait [#allocation6], 768  }
  0x25   :  { %961 = vsyncadd [#allocation6], 4294966528  ;;  %v969_v0 = vmov 0.0   ;;  %vm970_vm0 = vmmov 0   ;;  %v1004_v1 = vld [vmem:[#allocation2 + $0xf8] sm:$0xff]  ;;  %v1008_v3 = vld [vmem:[#allocation2 + $0xf0] sm:$0xff] }
  0x26   :  { %767 = vmatprep.subr.mxu1 %v969_v0  ;;  %799 = vmatprep.mubr.msk.f32.mxu1 %vm970_vm0, %v969_v0  ;;  %v1006_v2 = vld [vmem:[#allocation2 + $0x78] sm:$0xff]  ;;  %v1011_v4 = vld [vmem:[#allocation2 + $0x70] sm:$0xff]  ;;  %v1017_v6 = vld [vmem:[#allocation2 + $0xe8] sm:$0xff]  ;;  %s971_s28 = smov [#allocation8]  }
  0x27   :  { %611 = vmatprep.subr.mxu0 %v1004_v1  ;;  %v1013_v5 = vld [vmem:[#allocation2 + $0x178] sm:$0xff]  ;;  %v1019_v7 = vld [vmem:[#allocation2 + $0x170] sm:$0xff]  ;;  %v1023_v8 = vld [vmem:[#allocation2 + $0x68] sm:$0xff] }
  0x28   :  { %612 = vmatpush3.msra.mxu0 %v1006_v2  ;;  %768 = vmatpush3.msra.mxu1 %v1013_v5  ;;  %v1025_v9 = vld [vmem:[#allocation2 + $0x168] sm:$0xff]  ;;  %v1029_v10 = vld [vmem:[#allocation2 + $0xe0] sm:$0xff]  ;;  %v1039_v13 = vld [vmem:[#allocation2 + $0xd8] sm:$0xff] }
  0x29   :  { %613 = vmatprep.subr.mxu0 %v1008_v3  ;;  %769 = vmatprep.subr.mxu1 %v969_v0  ;;  %v1033_v11 = vld [vmem:[#allocation2 + $0x60] sm:$0xff]  ;;  %v1043_v14 = vld [vmem:[#allocation2 + $0x58] sm:$0xff]  ;;  %v1049_v16 = vld [vmem:[#allocation2 + $0xd0] sm:$0xff] }
  0x2a   :  { %614 = vmatpush3.msra.mxu0 %v1011_v4  ;;  %770 = vmatpush3.msra.mxu1 %v1019_v7  ;;  %v1035_v12 = vld [vmem:[#allocation2 + $0x160] sm:$0xff]  ;;  %v1045_v15 = vld [vmem:[#allocation2 + $0x158] sm:$0xff]  ;;  %v1053_v17 = vld [vmem:[#allocation2 + $0x50] sm:$0xff] }
  0x2b   :  { %615 = vmatprep.subr.mxu0 %v1017_v6  ;;  %771 = vmatprep.subr.mxu1 %v969_v0  ;;  %v1055_v18 = vld [vmem:[#allocation2 + $0x150] sm:$0xff]  ;;  %v1059_v19 = vld [vmem:[#allocation2 + $0xc8] sm:$0xff]  ;;  %v1069_v22 = vld [vmem:[#allocation2 + $0xc0] sm:$0xff] }
  0x2c   :  { %616 = vmatpush3.msra.mxu0 %v1023_v8  ;;  %772 = vmatpush3.msra.mxu1 %v1025_v9  ;;  %v1063_v20 = vld [vmem:[#allocation2 + $0x48] sm:$0xff]  ;;  %v1073_v23 = vld [vmem:[#allocation2 + $0x40] sm:$0xff]  ;;  %v1079_v25 = vld [vmem:[#allocation2 + $0xb8] sm:$0xff] }
  0x2d   :  { %617 = vmatprep.subr.mxu0 %v1029_v10  ;;  %773 = vmatprep.subr.mxu1 %v969_v0  ;;  %v1065_v21 = vld [vmem:[#allocation2 + $0x148] sm:$0xff]  ;;  %v1075_v24 = vld [vmem:[#allocation2 + $0x140] sm:$0xff]  ;;  %v1083_v26 = vld [vmem:[#allocation2 + $0x38] sm:$0xff] }
  0x2e   :  { %618 = vmatpush3.msra.mxu0 %v1033_v11  ;;  %774 = vmatpush3.msra.mxu1 %v1035_v12  ;;  %v1085_v27 = vld [vmem:[#allocation2 + $0x138] sm:$0xff]  ;;  %v1089_v28 = vld [vmem:[#allocation2 + $0xb0] sm:$0xff]  ;;  %v1099_v31 = vld [vmem:[#allocation2 + $0xa8] sm:$0xff] }
  0x2f   :  { %619 = vmatprep.subr.mxu0 %v1039_v13  ;;  %775 = vmatprep.subr.mxu1 %v969_v0  ;;  %v1093_v29 = vld [vmem:[#allocation2 + $0x30] sm:$0xff]  ;;  %v1103_v32 = vld [vmem:[#allocation2 + $0x28] sm:$0xff]  ;;  %v1109_v34 = vld [vmem:[#allocation2 + $0xa0] sm:$0xff] }
  0x30   :  { %620 = vmatpush3.msra.mxu0 %v1043_v14  ;;  %776 = vmatpush3.msra.mxu1 %v1045_v15  ;;  %v1095_v30 = vld [vmem:[#allocation2 + $0x130] sm:$0xff]  ;;  %v1105_v33 = vld [vmem:[#allocation2 + $0x128] sm:$0xff]  ;;  %v1113_v35 = vld [vmem:[#allocation2 + $0x20] sm:$0xff] }
  0x31   :  { %621 = vmatprep.subr.mxu0 %v1049_v16  ;;  %777 = vmatprep.subr.mxu1 %v969_v0  ;;  %v1115_v36 = vld [vmem:[#allocation2 + $0x120] sm:$0xff]  ;;  %v1119_v37 = vld [vmem:[#allocation2 + $0x98] sm:$0xff]  ;;  %v1127_v40 = vld [vmem:[#allocation5 + $0x8] sm:$0xff] }
  0x32   :  { %622 = vmatpush3.msra.mxu0 %v1053_v17  ;;  %778 = vmatpush3.msra.mxu1 %v1055_v18  ;;  %v1121_v38 = vld [vmem:[#allocation2 + $0x18] sm:$0xff]  ;;  %v1129_v41 = vld [vmem:[#allocation7 + $0x8] sm:$0xff]  ;;  %v1133_v42 = vld [vmem:[#allocation2 + $0x90] sm:$0xff]  ;;  %v256_v58 = vmul.f32 %v1127_v40, %v1127_v40 }
  0x33   :  { %623 = vmatprep.subr.mxu0 %v1059_v19  ;;  %779 = vmatprep.subr.mxu1 %v969_v0  ;;  %v1125_v39 = vld [vmem:[#allocation2 + $0x118] sm:$0xff]  ;;  %v1137_v43 = vld [vmem:[#allocation2 + $0x10] sm:$0xff]  ;;  %v1143_v45 = vld [vmem:[#allocation2 + $0x88] sm:$0xff]  ;;  %v113_v46 = vmul.f32 %v1129_v41, %v1127_v40  ;;  %v399_v61 = vmul.f32 %v1129_v41, %v1129_v41 }
  0x34   :  { %624 = vmatpush3.msra.mxu0 %v1063_v20  ;;  %780 = vmatpush3.msra.mxu1 %v1065_v21  ;;  %v1139_v44 = vld [vmem:[#allocation2 + $0x110] sm:$0xff]  ;;  %v1147_v47 = vld [vmem:[#allocation5] sm:$0xff]  ;;  %v1149_v48 = vld [vmem:[#allocation7] sm:$0xff] }
  0x35   :  { %625 = vmatprep.subr.mxu0 %v1069_v22  ;;  %781 = vmatprep.subr.mxu1 %v969_v0  ;;  %v1153_v49 = vld [vmem:[#allocation2 + $0x8] sm:$0xff]  ;;  %v1157_v50 = vld [vmem:[#allocation2 + $0x80] sm:$0xff]  ;;  %v112_v53 = vmul.f32 %v1149_v48, %v1147_v47  ;;  %v1167_v54 = vld [vmem:[#allocation5 + $0x10] sm:$0xff]  ;;  %v255_v59 = vmul.f32 %v1147_v47, %v1147_v47  ;;  %v398_v62 = vmul.f32 %v1149_v48, %v1149_v48 }
  0x36   :  { %626 = vmatpush3.msra.mxu0 %v1073_v23  ;;  %782 = vmatpush3.msra.mxu1 %v1075_v24  ;;  %v1159_v51 = vld [vmem:[#allocation2 + $0x108] sm:$0xff]  ;;  %v1163_v52 = vld [vmem:[#allocation2] sm:$0xff]  ;;  %v257_v60 = vmul.f32 %v1167_v54, %v1167_v54 }
  0x37   :  { %627 = vmatprep.subr.mxu0 %v1079_v25  ;;  %783 = vmatprep.subr.mxu1 %v969_v0  ;;  %v1169_v55 = vld [vmem:[#allocation7 + $0x10] sm:$0xff]  ;;  %v1174_v56 = vld [vmem:[#allocation2 + $0x100] sm:$0xff] }
  0x38   :  { %628 = vmatpush3.msra.mxu0 %v1083_v26  ;;  %784 = vmatpush3.msra.mxu1 %v1085_v27  ;;  %v114_v57 = vmul.f32 %v1169_v55, %v1167_v54  ;;  %v400_v63 = vmul.f32 %v1169_v55, %v1169_v55 }
  0x39   :  { %629 = vmatprep.subr.mxu0 %v1089_v28  ;;  %785 = vmatprep.subr.mxu1 %v969_v0 }
  0x3a   :  { %630 = vmatpush3.msra.mxu0 %v1093_v29  ;;  %786 = vmatpush3.msra.mxu1 %v1095_v30 }
  0x3b   :  { %631 = vmatprep.subr.mxu0 %v1099_v31  ;;  %787 = vmatprep.subr.mxu1 %v969_v0 }
  0x3c   :  { %632 = vmatpush3.msra.mxu0 %v1103_v32  ;;  %788 = vmatpush3.msra.mxu1 %v1105_v33 }
  0x3d   :  { %633 = vmatprep.subr.mxu0 %v1109_v34  ;;  %789 = vmatprep.subr.mxu1 %v969_v0 }
  0x3e   :  { %634 = vmatpush3.msra.mxu0 %v1113_v35  ;;  %790 = vmatpush3.msra.mxu1 %v1115_v36 }
  0x3f   :  { %635 = vmatprep.subr.mxu0 %v1119_v37  ;;  %791 = vmatprep.subr.mxu1 %v969_v0 }
  0x40   :  { %636 = vmatpush3.msra.mxu0 %v1121_v38  ;;  %792 = vmatpush3.msra.mxu1 %v1125_v39 }
  0x41   :  { %637 = vmatprep.subr.mxu0 %v1133_v42  ;;  %793 = vmatprep.subr.mxu1 %v969_v0 }
  0x42   :  { %638 = vmatpush3.msra.mxu0 %v1137_v43  ;;  %794 = vmatpush3.msra.mxu1 %v1139_v44 }
  0x43   :  { %639 = vmatprep.subr.mxu0 %v1143_v45  ;;  %795 = vmatprep.subr.mxu1 %v969_v0 }
  0x44   :  { %640 = vmatpush3.msra.mxu0 %v1153_v49  ;;  %179 = vmatprep.mubr.f32.mxu0 %v113_v46 }
  0x45   :  { %641 = vmatprep.subr.mxu0 %v1157_v50  ;;  %796 = vmatpush3.msra.mxu1 %v1159_v51 }
  0x46   :  { %642 = vmatpush3.msra.mxu0 %v1163_v52  ;;  %797 = vmatprep.subr.mxu1 %v969_v0 }
  0x47   :  { %180 = vmatmul.mubr.f32.vlgmr.msra.gmra.mxu0 %v112_v53  ;;  %663 = vmatprep.subr.mxu0 %v1004_v1 }
  0x48   :  { %798 = vmatpush3.msra.mxu1 %v1174_v56  ;;  %664 = vmatpush3.msra.mxu0 %v1006_v2 }
  0x49   :  { %665 = vmatprep.subr.mxu0 %v1008_v3  ;;  %802 = vmatprep.subr.mxu1 %v969_v0 }
  0x4a   :  { %800 = vmatmul.mubr.f32.vlgmr.msra.gmra.mxu1 %v114_v57  ;;  %666 = vmatpush3.msra.mxu0 %v1011_v4 }
  0x4b   :  { %803 = vmatpush3.msra.mxu1 %v1013_v5  ;;  %667 = vmatprep.subr.mxu0 %v1017_v6 }
  0x4c   :  { %804 = vmatprep.subr.mxu1 %v969_v0  ;;  %668 = vmatpush3.msra.mxu0 %v1023_v8 }
  0x4d   :  { %805 = vmatpush3.msra.mxu1 %v1019_v7  ;;  %669 = vmatprep.subr.mxu0 %v1029_v10 }
  0x4e   :  { %806 = vmatprep.subr.mxu1 %v969_v0  ;;  %670 = vmatpush3.msra.mxu0 %v1033_v11 }
  0x4f   :  { %807 = vmatpush3.msra.mxu1 %v1025_v9  ;;  %671 = vmatprep.subr.mxu0 %v1039_v13 }
  0x50   :  { %808 = vmatprep.subr.mxu1 %v969_v0  ;;  %672 = vmatpush3.msra.mxu0 %v1043_v14 }
  0x51   :  { %809 = vmatpush3.msra.mxu1 %v1035_v12  ;;  %673 = vmatprep.subr.mxu0 %v1049_v16 }
  0x52   :  { %810 = vmatprep.subr.mxu1 %v969_v0  ;;  %674 = vmatpush3.msra.mxu0 %v1053_v17 }
  0x53   :  { %811 = vmatpush3.msra.mxu1 %v1045_v15  ;;  %675 = vmatprep.subr.mxu0 %v1059_v19 }
  0x54   :  { %812 = vmatprep.subr.mxu1 %v969_v0  ;;  %676 = vmatpush3.msra.mxu0 %v1063_v20 }
  0x55   :  { %813 = vmatpush3.msra.mxu1 %v1055_v18  ;;  %677 = vmatprep.subr.mxu0 %v1069_v22 }
  0x56   :  { %814 = vmatprep.subr.mxu1 %v969_v0  ;;  %678 = vmatpush3.msra.mxu0 %v1073_v23 }
  0x57   :  { %815 = vmatpush3.msra.mxu1 %v1065_v21  ;;  %679 = vmatprep.subr.mxu0 %v1079_v25 }
  0x58   :  { %816 = vmatprep.subr.mxu1 %v969_v0  ;;  %680 = vmatpush3.msra.mxu0 %v1083_v26 }
  0x59   :  { %817 = vmatpush3.msra.mxu1 %v1075_v24  ;;  %681 = vmatprep.subr.mxu0 %v1089_v28 }
  0x5a   :  { %818 = vmatprep.subr.mxu1 %v969_v0  ;;  %682 = vmatpush3.msra.mxu0 %v1093_v29 }
  0x5b   :  { %819 = vmatpush3.msra.mxu1 %v1085_v27  ;;  %683 = vmatprep.subr.mxu0 %v1099_v31 }
  0x5c   :  { %820 = vmatprep.subr.mxu1 %v969_v0  ;;  %684 = vmatpush3.msra.mxu0 %v1103_v32 }
  0x5d   :  { %821 = vmatpush3.msra.mxu1 %v1095_v30  ;;  %685 = vmatprep.subr.mxu0 %v1109_v34 }
  0x5e   :  { %822 = vmatprep.subr.mxu1 %v969_v0  ;;  %686 = vmatpush3.msra.mxu0 %v1113_v35 }
  0x5f   :  { %823 = vmatpush3.msra.mxu1 %v1105_v33  ;;  %687 = vmatprep.subr.mxu0 %v1119_v37 }
  0x60   :  { %824 = vmatprep.subr.mxu1 %v969_v0  ;;  %688 = vmatpush3.msra.mxu0 %v1121_v38 }
  0x61   :  { %825 = vmatpush3.msra.mxu1 %v1115_v36  ;;  %689 = vmatprep.subr.mxu0 %v1133_v42 }
  0x62   :  { %826 = vmatprep.subr.mxu1 %v969_v0  ;;  %690 = vmatpush3.msra.mxu0 %v1137_v43 }
  0x63   :  { %827 = vmatpush3.msra.mxu1 %v1125_v39  ;;  %691 = vmatprep.subr.mxu0 %v1143_v45 }
  0x64   :  { %828 = vmatprep.subr.mxu1 %v969_v0  ;;  %692 = vmatpush3.msra.mxu0 %v1153_v49 }
  0x65   :  { %829 = vmatpush3.msra.mxu1 %v1139_v44  ;;  %693 = vmatprep.subr.mxu0 %v1157_v50 }
  0x66   :  { %830 = vmatprep.subr.mxu1 %v969_v0  ;;  %694 = vmatpush3.msra.mxu0 %v1163_v52 }
  0x67   :  { %322 = vmatprep.mubr.f32.mxu0 %v256_v58  ;;  %831 = vmatpush3.msra.mxu1 %v1159_v51 }
  0x68   :  { %323 = vmatmul.mubr.f32.vlgmr.msra.gmra.mxu0 %v255_v59  ;;  %832 = vmatprep.subr.mxu1 %v969_v0 }
  0x69   :  { %715 = vmatprep.subr.mxu0 %v1004_v1  ;;  %833 = vmatpush3.msra.mxu1 %v1174_v56 }
  0x6a   :  { %716 = vmatpush3.msra.mxu0 %v1006_v2  ;;  %834 = vmatprep.mubr.msk.f32.mxu1 %vm970_vm0, %v969_v0 }
  0x6b   :  { %717 = vmatprep.subr.mxu0 %v1008_v3  ;;  %837 = vmatprep.subr.mxu1 %v969_v0 }
  0x6c   :  { %835 = vmatmul.mubr.f32.vlgmr.msra.gmra.mxu1 %v257_v60  ;;  %718 = vmatpush3.msra.mxu0 %v1011_v4 }
  0x6d   :  { %838 = vmatpush3.msra.mxu1 %v1013_v5  ;;  %719 = vmatprep.subr.mxu0 %v1017_v6 }
  0x6e   :  { %839 = vmatprep.subr.mxu1 %v969_v0  ;;  %720 = vmatpush3.msra.mxu0 %v1023_v8 }
  0x6f   :  { %840 = vmatpush3.msra.mxu1 %v1019_v7  ;;  %721 = vmatprep.subr.mxu0 %v1029_v10 }
  0x70   :  { %841 = vmatprep.subr.mxu1 %v969_v0  ;;  %722 = vmatpush3.msra.mxu0 %v1033_v11 }
  0x71   :  { %842 = vmatpush3.msra.mxu1 %v1025_v9  ;;  %723 = vmatprep.subr.mxu0 %v1039_v13 }
  0x72   :  { %843 = vmatprep.subr.mxu1 %v969_v0  ;;  %724 = vmatpush3.msra.mxu0 %v1043_v14 }
  0x73   :  { %844 = vmatpush3.msra.mxu1 %v1035_v12  ;;  %725 = vmatprep.subr.mxu0 %v1049_v16 }
  0x74   :  { %845 = vmatprep.subr.mxu1 %v969_v0  ;;  %726 = vmatpush3.msra.mxu0 %v1053_v17 }
  0x75   :  { %846 = vmatpush3.msra.mxu1 %v1045_v15  ;;  %727 = vmatprep.subr.mxu0 %v1059_v19 }
  0x76   :  { %847 = vmatprep.subr.mxu1 %v969_v0  ;;  %728 = vmatpush3.msra.mxu0 %v1063_v20 }
  0x77   :  { %848 = vmatpush3.msra.mxu1 %v1055_v18  ;;  %729 = vmatprep.subr.mxu0 %v1069_v22 }
  0x78   :  { %849 = vmatprep.subr.mxu1 %v969_v0  ;;  %730 = vmatpush3.msra.mxu0 %v1073_v23 }
  0x79   :  { %850 = vmatpush3.msra.mxu1 %v1065_v21  ;;  %731 = vmatprep.subr.mxu0 %v1079_v25 }
  0x7a   :  { %851 = vmatprep.subr.mxu1 %v969_v0  ;;  %732 = vmatpush3.msra.mxu0 %v1083_v26 }
  0x7b   :  { %852 = vmatpush3.msra.mxu1 %v1075_v24  ;;  %733 = vmatprep.subr.mxu0 %v1089_v28 }
  0x7c   :  { %853 = vmatprep.subr.mxu1 %v969_v0  ;;  %734 = vmatpush3.msra.mxu0 %v1093_v29  ;;  %v560_v29 = vlaneseq }
  0x7d   :  { %854 = vmatpush3.msra.mxu1 %v1085_v27  ;;  %735 = vmatprep.subr.mxu0 %v1099_v31 }
  0x7e   :  { %855 = vmatprep.subr.mxu1 %v969_v0  ;;  %736 = vmatpush3.msra.mxu0 %v1103_v32  ;;  %v561_v31 = vshrl.u32 %v560_v29, 7 }
  0x7f   :  { %856 = vmatpush3.msra.mxu1 %v1095_v30  ;;  %737 = vmatprep.subr.mxu0 %v1109_v34 }
  0x80   :  { %857 = vmatprep.subr.mxu1 %v969_v0  ;;  %738 = vmatpush3.msra.mxu0 %v1113_v35  ;;  %vm564_vm5 = vcmp.lt.s32.totalorder %v561_v31, 7 }
  0x81   :  { %858 = vmatpush3.msra.mxu1 %v1105_v33  ;;  %739 = vmatprep.subr.mxu0 %v1119_v37 }
  0x82   :  { %859 = vmatprep.subr.mxu1 %v969_v0  ;;  %740 = vmatpush3.msra.mxu0 %v1121_v38 }
  0x83   :  { %860 = vmatpush3.msra.mxu1 %v1115_v36  ;;  %741 = vmatprep.subr.mxu0 %v1133_v42 }
  0x84   :  { %861 = vmatprep.subr.mxu1 %v969_v0  ;;  %742 = vmatpush3.msra.mxu0 %v1137_v43 }
  0x85   :  { %862 = vmatpush3.msra.mxu1 %v1125_v39  ;;  %743 = vmatprep.subr.mxu0 %v1143_v45 }
  0x86   :  { %863 = vmatprep.subr.mxu1 %v969_v0  ;;  %744 = vmatpush3.msra.mxu0 %v1153_v49 }
  0x87   :  { %864 = vmatpush3.msra.mxu1 %v1139_v44  ;;  %745 = vmatprep.subr.mxu0 %v1157_v50 }
  0x88   :  { %865 = vmatprep.subr.mxu1 %v969_v0  ;;  %746 = vmatpush3.msra.mxu0 %v1163_v52 }
  0x89   :  { %465 = vmatprep.mubr.f32.mxu0 %v399_v61  ;;  %866 = vmatpush3.msra.mxu1 %v1159_v51 }
  0x8a   :  { %466 = vmatmul.mubr.f32.vlgmr.msra.gmra.mxu0 %v398_v62  ;;  %867 = vmatprep.subr.mxu1 %v969_v0 }
  0x8b   :  { %868 = vmatpush3.msra.mxu1 %v1174_v56  ;;  %869 = vmatprep.mubr.msk.f32.mxu1 %vm970_vm0, %v969_v0 }
  0x8c   :  { %870 = vmatmul.mubr.f32.vlgmr.msra.gmra.mxu1 %v400_v63 }
 0x107   :  { %v643_v5 = vpop.f32.mrf.mxu0 }
 0x109   :  { %v644_v6 = vpop.f32.mrf.mxu0 }
 0x10a   :  { %v251_v1 = vpop.f32.mrf.mxu1  ;;  %v645_v30 = vadd.f32 %v644_v6, %v643_v5 }
 0x10c   :  { %v801_v2 = vpop.f32.mrf.mxu1  ;;  %v252_v32 = vadd.f32 %v645_v30, %v251_v1 }
 0x128   :  { %v695_v7 = vpop.f32.mrf.mxu0 }
 0x12a   :  { %v696_v8 = vpop.f32.mrf.mxu0 }
 0x12b   :  { %v697_v9 = vadd.f32 %v696_v8, %v695_v7 }
 0x12c   :  { %v394_v3 = vpop.f32.mrf.mxu1 }
 0x12d   :  { %v395_v10 = vadd.f32 %v697_v9, %v394_v3 }
 0x12e   :  { %v836_v4 = vpop.f32.mrf.mxu1 }
 0x12f   :  { %884 = vrsqrt.f32 %v395_v10  ;;  %vm543_vm1 = vcmp.eq.f32.partialorder %v395_v10, inf  ;;  %v546_v22 = vand.u32 2147483648, %v395_v10  ;;  %vm545_vm3 = vcmp.eq.f32.partialorder %v395_v10, 0.0 }
 0x13c   :  { %v885_v17 = vpop.eup %884 }
 0x13d   :  { %v542_v18 = vmul.f32 %v885_v17, %v395_v10 }
 0x13f   :  { %v544_v20 = vsel %vm543_vm1, %v395_v10, %v542_v18 }
 0x140   :  { %v547_v25 = vsel %vm545_vm3, %v546_v22, %v544_v20 }
 0x14a   :  { %v747_v11 = vpop.f32.mrf.mxu0 }
 0x14c   :  { %v748_v12 = vpop.f32.mrf.mxu0  ;;  %v537_v13 = vpop.f32.mrf.mxu1 }
 0x14d   :  { %v749_v14 = vadd.f32 %v748_v12, %v747_v11 }
 0x14e   :  { %v871_v15 = vpop.f32.mrf.mxu1 }
 0x14f   :  { %v538_v16 = vadd.f32 %v749_v14, %v537_v13 }
 0x151   :  { %886 = vrsqrt.f32 %v538_v16  ;;  %vm550_vm2 = vcmp.eq.f32.partialorder %v538_v16, inf  ;;  %v553_v23 = vand.u32 2147483648, %v538_v16  ;;  %vm552_vm4 = vcmp.eq.f32.partialorder %v538_v16, 0.0 }
 0x152   :  { %vm565_vm6 = vcmp.gt.f32.partialorder %v538_v16, 0.0 }
 0x153   :  { %vm566_vm7 = vmand %vm564_vm5, %vm565_vm6 }
 0x154   :  { %v610_v37 = vsel %vm566_vm7, 1.0, %v969_v0 }
 0x15e   :  { %v887_v19 = vpop.eup %886 }
 0x15f   :  { %v549_v21 = vmul.f32 %v887_v19, %v538_v16 }
 0x161   :  { %v551_v24 = vsel %vm550_vm2, %v538_v16, %v549_v21 }
 0x162   :  { %v554_v26 = vsel %vm552_vm4, %v553_v23, %v551_v24 }
 0x163   :  { %v555_v27 = vmul.f32 %v554_v26, %v547_v25 }
 0x165   :  { %v556_v28 = vmax.f32 %v555_v27, 1e-08 }
 0x167   :  { %888 = vrcp.f32 %v556_v28 }
 0x174   :  { %v889_v33 = vpop.eup %888 }
 0x175   :  { %v558_v34 = vmul.f32 %v889_v33, %v252_v32 }
 0x177   :  { %v567_v35 = vsub.f32 1.0, %v558_v34 }
 0x179   :  { %v568_v36 = vsel %vm566_vm7, %v567_v35, 0.0 }
 0x17a   :  { %569 = vadd.xlane.f32.xlu0 %v568_v36 }
 0x17e   :  { %581 = vadd.xlane.f32.xlu0 %v610_v37 }
 0x203   :  { %v570_v38 = vpop.xlane.xlu0 %569 }
 0x204   :  { %v571_v39 = vrot.slane %v570_v38, 4 }
 0x206   :  { %v572_v40 = vadd.f32 %v571_v39, %v570_v38 }
 0x207   :  { %v582_v41 = vpop.xlane.xlu0 %581 }
 0x208   :  { %v573_v42 = vrot.slane %v572_v40, 2  ;;  %v583_v43 = vrot.slane %v582_v41, 4 }
 0x20a   :  { %v584_v44 = vadd.f32 %v583_v43, %v582_v41  ;;  %v574_v45 = vadd.f32 %v573_v42, %v572_v40 }
 0x20c   :  { %v585_v46 = vrot.slane %v584_v44, 2  ;;  %v575_v47 = vrot.slane %v574_v45, 1 }
 0x20e   :  { %v586_v48 = vadd.f32 %v585_v46, %v584_v44  ;;  %v576_v49 = vadd.f32 %v575_v47, %v574_v45 }
 0x210   :  { %872 = vpush %v576_v49  ;;  %v587_v50 = vrot.slane %v586_v48, 1 }
 0x212   :  { %v588_v51 = vadd.f32 %v587_v50, %v586_v48 }
 0x214   :  { %874 = vpush %v588_v51 }
 0x241   :  { %s873_s0 = spop %872 }
 0x242   :  { %592 = sst [smem:[#allocation8]] %s873_s0 }
 0x245   :  { %s875_s2 = spop %874 }
 0x246   :  { %594 = sst [smem:[#allocation8 + $0x1]] %s875_s2 }
 0x247   :  { %602 = dma.smem_to_hbm %s971_s28, 16, %s1332_s3, [#allocation4]  }
 0x248   :  { %962 = dma.done.wait [#allocation4], 16  }
 0x249   :  { %963 = vsyncadd [#allocation4], 4294967280 }
 0x24a   :  { %606 = sfence }
 0x24b   :  { %607 = vsyncpa [#allocation3], 1 }
 0x24c   :  { %608 = vsyncpa [#allocation6], 1 }
 0x24d   :  { %609 = vsyncpa [#allocation4], 1 }

</bundles_post_ra>
